<compile_context>
chip_gen: v7x
topology: tpu7x:2x2x1
jax: 0.10.0
libtpu: 0.0.40
codegen_flags: <defaults>
</compile_context>

<pallas_src>
import functools

import jax
import jax.numpy as jnp
import numpy as np
from jax.experimental import pallas as pl
from jax.experimental.pallas import tpu as pltpu

EPS = 1e-5


# ------------------------------ fused kernel --------------------------------
def fused_conv_bn_relu_kernel(x_ref, w_ref, gamma_ref, beta_ref, o_ref,
                              sum_acc, sumsq_acc, scale_sc, shift_sc, *, inv_m):
    phase = pl.program_id(0)   # 0: accumulate stats, 1: normalize + ReLU
    tile = pl.program_id(1)

    # 1x1 conv as a channel matmul, lane-dense in the row (pixel) axis:
    # (Cout, Cin) @ (Cin, tm) -> (Cout, tm), bf16 inputs, f32 accumulation.
    y = jnp.dot(w_ref[...], x_ref[...], preferred_element_type=jnp.float32)

    @pl.when(phase == 0)
    def _():
        @pl.when(tile == 0)
        def _():
            sum_acc[...] = jnp.zeros_like(sum_acc)
            sumsq_acc[...] = jnp.zeros_like(sumsq_acc)
        # Per-channel batch statistics (lane reduce on the XLU; kernel is
        # memory bound so this slot is free).
        sum_acc[...] += jnp.sum(y, axis=1, keepdims=True)
        sumsq_acc[...] += jnp.sum(y * y, axis=1, keepdims=True)

    @pl.when(jnp.logical_and(phase == 1, tile == 0))
    def _():
        # Precompute the BN affine once: scale = gamma * rsqrt(var + eps),
        # shift = beta - mean * scale.  Biased (training-mode) variance,
        # clamped to >= 0 against catastrophic cancellation of E[y^2]-E[y]^2.
        mean = sum_acc[...] * inv_m
        var = jnp.maximum(sumsq_acc[...] * inv_m - mean * mean, 0.0)
        scale = gamma_ref[...] * jax.lax.rsqrt(var + EPS)
        scale_sc[...] = scale
        shift_sc[...] = beta_ref[...] - mean * scale

    @pl.when(phase == 1)
    def _():
        # Single FMA + max per element; (Cout, 1) params broadcast over lanes.
        o_ref[...] = jnp.maximum(y * scale_sc[...] + shift_sc[...], 0.0)


# -------------------------------- wrapper ------------------------------------
def conv_bn_relu_forward(x_nchw, w_oihw, bias, gamma, beta, *, tm=2048,
                         compute_dtype=jnp.bfloat16):
    # The conv bias cancels exactly under training-mode BatchNorm (shift
    # invariance of mean-subtraction and variance), so it is not used.
    del bias

    N, Cin, H, W = x_nchw.shape
    Cout = w_oihw.shape[0]
    M = N * H * W

    # Row tile: multiple of 128 lanes, no larger than the (padded) row count.
    tm = min(tm, pl.cdiv(M, 128) * 128)
    tm = max(128, (tm // 128) * 128)
    num_tiles = pl.cdiv(M, tm)
    M_pad = num_tiles * tm

    # Layout plumbing (cheap major-dim transposes only): NCHW -> (Cin, M).
    # Zero-padded rows produce conv output 0 (no bias), so they contribute
    # exactly 0 to the channel statistics, which are divided by the true M.
    x2d = jnp.transpose(x_nchw, (1, 0, 2, 3)).reshape(Cin, M)
    if M_pad != M:
        x2d = jnp.pad(x2d, ((0, 0), (0, M_pad - M)))
    x2d = x2d.astype(compute_dtype)
    w2d = w_oihw.reshape(Cout, Cin).astype(compute_dtype)
    g2 = gamma.reshape(Cout, 1).astype(jnp.float32)
    b2 = beta.reshape(Cout, 1).astype(jnp.float32)

    itemsize = jnp.dtype(compute_dtype).itemsize
    # VMEM: double-buffered x / out tiles + resident weight / params / scratch.
    vmem_need = (2 * Cin * tm * itemsize          # x tiles (bf16)
                 + 2 * Cout * tm * 4              # out tiles (f32)
                 + Cout * Cin * itemsize          # weight
                 + 2 * Cout * 4                   # gamma / beta
                 + 4 * 8 * 128 * 4)               # scratch (padded vregs)
    vmem_limit = int(min(max(4 * vmem_need, 8 * 1024 * 1024), 48 * 1024 * 1024))

    cost = pl.CostEstimate(
        flops=int(2 * 2 * M_pad * Cin * Cout + 4 * M_pad * Cout),
        transcendentals=int(Cout),
        bytes_accessed=int(2 * Cin * M_pad * itemsize   # x read twice
                           + Cout * M_pad * 4           # output write
                           + 2 * Cout * Cin * itemsize  # weight
                           + 2 * Cout * 4),             # gamma / beta
    )

    out2d = pl.pallas_call(
        functools.partial(fused_conv_bn_relu_kernel, inv_m=1.0 / M),
        out_shape=jax.ShapeDtypeStruct((Cout, M_pad), jnp.float32),
        grid=(2, num_tiles),
        in_specs=[
            pl.BlockSpec((Cin, tm), lambda p, i: (0, i)),      # x tile (read both phases)
            pl.BlockSpec((Cout, Cin), lambda p, i: (0, 0)),    # weight (resident)
            pl.BlockSpec((Cout, 1), lambda p, i: (0, 0)),      # gamma
            pl.BlockSpec((Cout, 1), lambda p, i: (0, 0)),      # beta
        ],
        # During phase 0 the output block index is pinned to 0 (never written
        # there, no writeback until phase 1 overwrites it), phase 1 walks the
        # row tiles -> each output block is written back exactly once.
        out_specs=pl.BlockSpec((Cout, tm), lambda p, i: (0, p * i)),
        scratch_shapes=[
            pltpu.VMEM((Cout, 1), jnp.float32),   # per-channel sum
            pltpu.VMEM((Cout, 1), jnp.float32),   # per-channel sum of squares
            pltpu.VMEM((Cout, 1), jnp.float32),   # BN scale
            pltpu.VMEM((Cout, 1), jnp.float32),   # BN shift
        ],
        compiler_params=pltpu.CompilerParams(
            # TODO(synk): on v7x (2 TensorCores) split the phase-0 stats into
            # per-core partial accumulators so the row-tile axis can be
            # "parallel"; kept sequential here so the scratch accumulation
            # cannot race.
            dimension_semantics=("arbitrary", "arbitrary"),
            vmem_limit_bytes=vmem_limit,
        ),
        cost_estimate=cost,
    )(x2d, w2d, g2, b2)

    # (Cout, M) -> NCHW (PyTorch output convention), major-dim transpose only.
    out = out2d[:, :M].reshape(Cout, N, H, W)
    return jnp.transpose(out, (1, 0, 2, 3))


# ---------------------------- pure-JAX reference ------------------------------
def ref_forward(x, w, bias, gamma, beta, compute_dtype=jnp.bfloat16):
    y = jax.lax.conv_general_dilated(
        x.astype(compute_dtype), w.astype(compute_dtype),
        window_strides=(1, 1), padding="VALID",
        dimension_numbers=("NCHW", "OIHW", "NCHW"),
        preferred_element_type=jnp.float32,
    ) + bias.reshape(1, -1, 1, 1).astype(jnp.float32)
    mean = jnp.mean(y, axis=(0, 2, 3), keepdims=True)
    var = jnp.mean((y - mean) ** 2, axis=(0, 2, 3), keepdims=True)
    yhat = (y - mean) / jnp.sqrt(var + EPS)
    return jnp.maximum(
        yhat * gamma.reshape(1, -1, 1, 1) + beta.reshape(1, -1, 1, 1), 0.0)


if __name__ == "__main__":
    # Small shapes consistent with the module's forward.
    N, Cin, Cout, H, W = 2, 4, 8, 16, 16
    kernel_size = 3
    eff_k = int((kernel_size - 1) / 2)   # what the module actually builds -> 1x1 conv
    assert eff_k == 1

    key = jax.random.PRNGKey(0)
    kx, kw, kb = jax.random.split(key, 3)

    x = jax.random.normal(kx, (N, Cin, H, W), dtype=jnp.float32)

    # Deterministic parameter init (PyTorch-style fan_in uniform for the conv;
    # BatchNorm2d default init: gamma = 1, beta = 0).
    fan_in = Cin * eff_k * eff_k
    bound = 1.0 / np.sqrt(fan_in)
    w = jax.random.uniform(kw, (Cout, Cin, eff_k, eff_k),
                           minval=-bound, maxval=bound, dtype=jnp.float32)
    b = jax.random.uniform(kb, (Cout,), minval=-bound, maxval=bound, dtype=jnp.float32)
    gamma = jnp.ones((Cout,), dtype=jnp.float32)
    beta = jnp.zeros((Cout,), dtype=jnp.float32)

    out = conv_bn_relu_forward(x, w, b, gamma, beta)
    out = jax.block_until_ready(out)

    ref = jax.block_until_ready(ref_forward(x, w, b, gamma, beta))
    np.testing.assert_allclose(np.asarray(out), np.asarray(ref), rtol=1e-3, atol=1e-3)

    print("KERNEL_OK")
</pallas_src>

<mosaic_0001>
module attributes {stable_mosaic.version = 11 : i64} {
  func.func @fused_conv_bn_relu_kernel(%arg0: i32, %arg1: i32, %arg2: memref<4x512xbf16, #tpu.memory_space<vmem>>, %arg3: memref<8x4xbf16, #tpu.memory_space<vmem>>, %arg4: memref<8x1xf32, #tpu.memory_space<vmem>>, %arg5: memref<8x1xf32, #tpu.memory_space<vmem>>, %arg6: memref<8x512xf32, #tpu.memory_space<vmem>>, %arg7: memref<8x1xf32, #tpu.memory_space<vmem>>, %arg8: memref<8x1xf32, #tpu.memory_space<vmem>>, %arg9: memref<8x1xf32, #tpu.memory_space<vmem>>, %arg10: memref<8x1xf32, #tpu.memory_space<vmem>>) attributes {dimension_semantics = [#tpu.dimension_semantics<arbitrary>, #tpu.dimension_semantics<arbitrary>], iteration_bounds = array<i64: 2, 1>, scalar_prefetch = 0 : i64, scratch_operands = 4 : i64, tpu.core_type = #tpu.core_type<tc>, window_params = [{transform_indices = @transform_0, window_bounds = array<i64: 4, 512>}, {pipeline_mode = #tpu.pipeline_mode<synchronous>, transform_indices = @transform_1, window_bounds = array<i64: 8, 4>}, {pipeline_mode = #tpu.pipeline_mode<synchronous>, transform_indices = @transform_2, window_bounds = array<i64: 8, 1>}, {pipeline_mode = #tpu.pipeline_mode<synchronous>, transform_indices = @transform_3, window_bounds = array<i64: 8, 1>}, {transform_indices = @transform_4, window_bounds = array<i64: 8, 512>}]} {
    %c0 = arith.constant 0 : index
    %c0_0 = arith.constant 0 : index
    %0 = vector.load %arg3[%c0, %c0_0] : memref<8x4xbf16, #tpu.memory_space<vmem>>, vector<8x4xbf16>
    %c0_1 = arith.constant 0 : index
    %c0_2 = arith.constant 0 : index
    %1 = vector.load %arg2[%c0_1, %c0_2] : memref<4x512xbf16, #tpu.memory_space<vmem>>, vector<4x512xbf16>
    %cst = arith.constant dense<0.000000e+00> : vector<8x512xf32>
    %2 = tpu.matmul %0, %1, %cst {dimension_numbers = #tpu.dot_dimension_numbers<[1], [0], [0], [1], [0, 0, 1, 1], [], []>} : vector<8x4xbf16>, vector<4x512xbf16>, vector<8x512xf32> -> vector<8x512xf32>
    %c0_i32 = arith.constant 0 : i32
    %3 = arith.cmpi eq, %arg0, %c0_i32 : i32
    %4 = arith.extui %3 : i1 to i32
    %c0_i32_3 = arith.constant 0 : i32
    %5 = arith.cmpi ne, %4, %c0_i32_3 : i32
    scf.if %5 {
      %c0_i32_8 = arith.constant 0 : i32
      %14 = arith.cmpi eq, %arg1, %c0_i32_8 : i32
      %15 = arith.extui %14 : i1 to i32
      %c0_i32_9 = arith.constant 0 : i32
      %16 = arith.cmpi ne, %15, %c0_i32_9 : i32
      scf.if %16 {
        %cst_20 = arith.constant 0.000000e+00 : f32
        %28 = vector.broadcast %cst_20 : f32 to vector<8x1xf32>
        %c0_21 = arith.constant 0 : index
        %c0_22 = arith.constant 0 : index
        %29 = vector.load %arg7[%c0_21, %c0_22] : memref<8x1xf32, #tpu.memory_space<vmem>>, vector<8x1xf32>
        tpu.vector_store %arg7[%c0_21, %c0_22], %28 {strides = array<i32>} : memref<8x1xf32, #tpu.memory_space<vmem>>, vector<8x1xf32>,
        %cst_23 = arith.constant 0.000000e+00 : f32
        %30 = vector.broadcast %cst_23 : f32 to vector<8x1xf32>
        %c0_24 = arith.constant 0 : index
        %c0_25 = arith.constant 0 : index
        %31 = vector.load %arg8[%c0_24, %c0_25] : memref<8x1xf32, #tpu.memory_space<vmem>>, vector<8x1xf32>
        tpu.vector_store %arg8[%c0_24, %c0_25], %30 {strides = array<i32>} : memref<8x1xf32, #tpu.memory_space<vmem>>, vector<8x1xf32>,
      } else {
      }
      %c0_10 = arith.constant 0 : index
      %c0_11 = arith.constant 0 : index
      %17 = vector.load %arg7[%c0_10, %c0_11] : memref<8x1xf32, #tpu.memory_space<vmem>>, vector<8x1xf32>
      %cst_12 = arith.constant dense<0.000000e+00> : vector<8xf32>
      %18 = vector.multi_reduction <add>, %2, %cst_12 [1] : vector<8x512xf32> to vector<8xf32>
      %19 = vector.shape_cast %18 : vector<8xf32> to vector<8x1xf32>
      %20 = arith.addf %17, %19 : vector<8x1xf32>
      %c0_13 = arith.constant 0 : index
      %c0_14 = arith.constant 0 : index
      %21 = vector.load %arg7[%c0_13, %c0_14] : memref<8x1xf32, #tpu.memory_space<vmem>>, vector<8x1xf32>
      tpu.vector_store %arg7[%c0_13, %c0_14], %20 {strides = array<i32>} : memref<8x1xf32, #tpu.memory_space<vmem>>, vector<8x1xf32>,
      %c0_15 = arith.constant 0 : index
      %c0_16 = arith.constant 0 : index
      %22 = vector.load %arg8[%c0_15, %c0_16] : memref<8x1xf32, #tpu.memory_space<vmem>>, vector<8x1xf32>
      %23 = arith.mulf %2, %2 : vector<8x512xf32>
      %cst_17 = arith.constant dense<0.000000e+00> : vector<8xf32>
      %24 = vector.multi_reduction <add>, %23, %cst_17 [1] : vector<8x512xf32> to vector<8xf32>
      %25 = vector.shape_cast %24 : vector<8xf32> to vector<8x1xf32>
      %26 = arith.addf %22, %25 : vector<8x1xf32>
      %c0_18 = arith.constant 0 : index
      %c0_19 = arith.constant 0 : index
      %27 = vector.load %arg8[%c0_18, %c0_19] : memref<8x1xf32, #tpu.memory_space<vmem>>, vector<8x1xf32>
      tpu.vector_store %arg8[%c0_18, %c0_19], %26 {strides = array<i32>} : memref<8x1xf32, #tpu.memory_space<vmem>>, vector<8x1xf32>,
    } else {
    }
    %c1_i32 = arith.constant 1 : i32
    %6 = arith.cmpi eq, %arg0, %c1_i32 : i32
    %c0_i32_4 = arith.constant 0 : i32
    %7 = arith.cmpi eq, %arg1, %c0_i32_4 : i32
    %8 = arith.andi %6, %7 : i1
    %9 = arith.extui %8 : i1 to i32
    %c0_i32_5 = arith.constant 0 : i32
    %10 = arith.cmpi ne, %9, %c0_i32_5 : i32
    scf.if %10 {
      %c0_8 = arith.constant 0 : index
      %c0_9 = arith.constant 0 : index
      %14 = vector.load %arg7[%c0_8, %c0_9] : memref<8x1xf32, #tpu.memory_space<vmem>>, vector<8x1xf32>
      %cst_10 = arith.constant 0.001953125 : f32
      %15 = vector.broadcast %cst_10 : f32 to vector<8x1xf32>
      %16 = arith.mulf %14, %15 : vector<8x1xf32>
      %c0_11 = arith.constant 0 : index
      %c0_12 = arith.constant 0 : index
      %17 = vector.load %arg8[%c0_11, %c0_12] : memref<8x1xf32, #tpu.memory_space<vmem>>, vector<8x1xf32>
      %cst_13 = arith.constant 0.001953125 : f32
      %18 = vector.broadcast %cst_13 : f32 to vector<8x1xf32>
      %19 = arith.mulf %17, %18 : vector<8x1xf32>
      %20 = arith.mulf %16, %16 : vector<8x1xf32>
      %21 = arith.subf %19, %20 : vector<8x1xf32>
      %cst_14 = arith.constant 0.000000e+00 : f32
      %22 = vector.broadcast %cst_14 : f32 to vector<8x1xf32>
      %23 = arith.maximumf %21, %22 : vector<8x1xf32>
      %c0_15 = arith.constant 0 : index
      %c0_16 = arith.constant 0 : index
      %24 = vector.load %arg4[%c0_15, %c0_16] : memref<8x1xf32, #tpu.memory_space<vmem>>, vector<8x1xf32>
      %cst_17 = arith.constant 9.99999974E-6 : f32
      %25 = vector.broadcast %cst_17 : f32 to vector<8x1xf32>
      %26 = arith.addf %23, %25 : vector<8x1xf32>
      %27 = math.rsqrt %26 : vector<8x1xf32>
      %28 = arith.mulf %24, %27 : vector<8x1xf32>
      %c0_18 = arith.constant 0 : index
      %c0_19 = arith.constant 0 : index
      %29 = vector.load %arg9[%c0_18, %c0_19] : memref<8x1xf32, #tpu.memory_space<vmem>>, vector<8x1xf32>
      tpu.vector_store %arg9[%c0_18, %c0_19], %28 {strides = array<i32>} : memref<8x1xf32, #tpu.memory_space<vmem>>, vector<8x1xf32>,
      %c0_20 = arith.constant 0 : index
      %c0_21 = arith.constant 0 : index
      %30 = vector.load %arg5[%c0_20, %c0_21] : memref<8x1xf32, #tpu.memory_space<vmem>>, vector<8x1xf32>
      %31 = arith.mulf %16, %28 : vector<8x1xf32>
      %32 = arith.subf %30, %31 : vector<8x1xf32>
      %c0_22 = arith.constant 0 : index
      %c0_23 = arith.constant 0 : index
      %33 = vector.load %arg10[%c0_22, %c0_23] : memref<8x1xf32, #tpu.memory_space<vmem>>, vector<8x1xf32>
      tpu.vector_store %arg10[%c0_22, %c0_23], %32 {strides = array<i32>} : memref<8x1xf32, #tpu.memory_space<vmem>>, vector<8x1xf32>,
    } else {
    }
    %c1_i32_6 = arith.constant 1 : i32
    %11 = arith.cmpi eq, %arg0, %c1_i32_6 : i32
    %12 = arith.extui %11 : i1 to i32
    %c0_i32_7 = arith.constant 0 : i32
    %13 = arith.cmpi ne, %12, %c0_i32_7 : i32
    scf.if %13 {
      %c0_8 = arith.constant 0 : index
      %c0_9 = arith.constant 0 : index
      %14 = vector.load %arg9[%c0_8, %c0_9] : memref<8x1xf32, #tpu.memory_space<vmem>>, vector<8x1xf32>
      %15 = vector.broadcast %14 : vector<8x1xf32> to vector<8x512xf32>
      %16 = arith.mulf %2, %15 : vector<8x512xf32>
      %c0_10 = arith.constant 0 : index
      %c0_11 = arith.constant 0 : index
      %17 = vector.load %arg10[%c0_10, %c0_11] : memref<8x1xf32, #tpu.memory_space<vmem>>, vector<8x1xf32>
      %18 = vector.broadcast %17 : vector<8x1xf32> to vector<8x512xf32>
      %19 = arith.addf %16, %18 : vector<8x512xf32>
      %cst_12 = arith.constant 0.000000e+00 : f32
      %20 = vector.broadcast %cst_12 : f32 to vector<8x512xf32>
      %21 = arith.maximumf %19, %20 : vector<8x512xf32>
      %c0_13 = arith.constant 0 : index
      %c0_14 = arith.constant 0 : index
      %22 = vector.load %arg6[%c0_13, %c0_14] : memref<8x512xf32, #tpu.memory_space<vmem>>, vector<8x512xf32>
      tpu.vector_store %arg6[%c0_13, %c0_14], %21 {strides = array<i32>} : memref<8x512xf32, #tpu.memory_space<vmem>>, vector<8x512xf32>,
    } else {
    }
    return
  }
  func.func @transform_0(%arg0: i32, %arg1: i32) -> (i32, i32) {
    %c0_i32 = arith.constant 0 : i32
    %c0_i32_0 = arith.constant 0 : i32
    return %c0_i32, %arg1 : i32, i32
  }
  func.func @transform_1(%arg0: i32, %arg1: i32) -> (i32, i32) {
    %c0_i32 = arith.constant 0 : i32
    %c0_i32_0 = arith.constant 0 : i32
    %c0_i32_1 = arith.constant 0 : i32
    return %c0_i32, %c0_i32_0 : i32, i32
  }
  func.func @transform_2(%arg0: i32, %arg1: i32) -> (i32, i32) {
    %c0_i32 = arith.constant 0 : i32
    %c0_i32_0 = arith.constant 0 : i32
    %c0_i32_1 = arith.constant 0 : i32
    return %c0_i32, %c0_i32_0 : i32, i32
  }
  func.func @transform_3(%arg0: i32, %arg1: i32) -> (i32, i32) {
    %c0_i32 = arith.constant 0 : i32
    %c0_i32_0 = arith.constant 0 : i32
    %c0_i32_1 = arith.constant 0 : i32
    return %c0_i32, %c0_i32_0 : i32, i32
  }
  func.func @transform_4(%arg0: i32, %arg1: i32) -> (i32, i32) {
    %0 = arith.muli %arg0, %arg1 : i32
    %c0_i32 = arith.constant 0 : i32
    %c0_i32_0 = arith.constant 0 : i32
    return %c0_i32, %0 : i32, i32
  }
}

</mosaic_0001>

<bundles_post_ra>
// kernel: tpu_custom_call.1
= control target key start
LH: loop header
LB: loop body
LE: loop exit
PB: predicated region body
PF: predicated region fallthrough
CT: control target
= control target key end

     0   :  { %9 = vsyncpa [#allocation7], 0  ;;  %s748_s0 = inlined_call_operand.vmem [shape: bf16[4,512], index: 0, kind: input, shape index: {}]   ;;  %s749_s1 = inlined_call_operand.vmem [shape: bf16[8,4], index: 1, kind: input, shape index: {}]   ;;  %s750_s2 = inlined_call_operand.vmem [shape: f32[8,1], index: 2, kind: input, shape index: {}]   ;;  %s751_s3 = inlined_call_operand.vmem [shape: f32[8,1], index: 3, kind: input, shape index: {}]   ;;  %s752_s4 = inlined_call_operand.hbm [shape: f32[8,512], index: 4, kind: output, shape index: {}]  }
   0x1   :  { %11 = vsyncpa [#allocation7 + $0x1], 0  ;;  %s651_s15 = smov 0   ;;  %s653_s16 = smov 0  }
   0x2   :  { %s655_s17 = smov 0  }
   0x3 LB: > { %s506_s18 = sadd.s32 4294967295, %s619_s17   ;;  %s507_s19 = sadd.s32 4294967294, %s619_s17   ;;  %s619_s17 = sphi %s655_s17, %s17_s17   ;;  %s615_s16 = sphi %s653_s16, %s755_s16   ;;  %s611_s15 = sphi %s651_s15, %s754_s15  }
   0x4   : > { %s29_s20 = sadd.s32 1, %s615_s16  ;;  %p510_p0 = scmp.ge.s32.totalorder %s619_s17, 1 }
   0x5   : > { %p31_p1 = scmp.ge.s32.totalorder %s29_s20, 2  ;;  %p180_p2 = scmp.lt.s32.totalorder %s619_s17, 3 }
   0x7   : > { %s757_s20 = smov (%p31_p1, %s29_s20), 0  ;;  %p181_p3 = pnand %p510_p0, %p180_p2 }
   0x8   : > { %v216_v0 = vld [vmem:[%s748_s0] sm:$0xff] (!%p181_p3)  ;;  %v222_v1 = vlaneseq (!%p181_p3)  ;;  %v621_v2 = vmov (!%p181_p3), 1983009808   ;;  %v622_v4 = vmov (!%p181_p3), 0   ;;  %vm239_vm0 = vcmask (!%p181_p3), 1041408   ;;  %p515_p4 = scmp.ne.s32.totalorder (!%p181_p3), %s611_s15, 0 }
   0x9   : > { %184 = sbr.rel (%p181_p3) target bundleno = 588 (0x24c), region = 36  ;;  %v220_v3 = vunpack.c.l.s4 (!%p181_p3), %v621_v2  ;;  %284 = vmatprep.mubr.bf16.mxu0 (!%p181_p3), %v622_v4  ;;  %325 = vmatprep.mubr.bf16.mxu1 (!%p181_p3), %v622_v4  ;;  %v218_v7 = vcombine.high (!%p181_p3), %v216_v0, %v216_v0  ;;  %v215_v15 = vld [vmem:[%s749_s1] sm:$0xf] (!%p181_p3)  ;;  %vm235_vm1 = vcmask (!%p181_p3), 31744  }
   0xa   : > { %v223_v5 = vshrl.u32 (!%p181_p3), %v222_v1, 7 }
   0xb   : > { %v221_v6 = vunpack.c.0.s8 (!%p181_p3), %v220_v3 }
   0xd   : > { %v224_v8 = vsub.s32 (!%p181_p3), %v221_v6, %v223_v5 }
   0xf   : > { %v225_v9 = vrot.slane (!%p181_p3), %v216_v0, %v224_v8  ;;  %v232_v10 = vrot.slane (!%p181_p3), %v218_v7, %v224_v8 }
  0x10   : > { %vm342_vm2 = vcmask (!%p515_p4), 7168   ;;  %v623_v34 = vmov (!%p515_p4), 0.0  }
  0x11   : > { %v233_v11 = vcombine.high %v225_v9, %v225_v9  ;;  %v234_v12 = vcombine.high %v232_v10, %v232_v10  ;;  %v241_v13 = vsel %vm239_vm0, %v225_v9, 0  ;;  %v247_v14 = vsel %vm239_vm0, %v232_v10, 0  ;;  %343 = vst.msk [vmem:[#allocation2] sm:$0xff] (!%p515_p4), %vm342_vm2, %v623_v34  ;;  %344 = vst.msk [vmem:[#allocation3] sm:$0xff] (!%p515_p4), %vm342_vm2, %v623_v34 }
  0x13   : > { %511 = vmatprep.subr.msk.bf16.mxu0 %vm239_vm0, %v233_v11  ;;  %513 = vmatprep.subr.msk.bf16.mxu1 %vm239_vm0, %v234_v12 }
  0x14   : > { %253 = vmatpush1.bf16.msra.mxu0 %v241_v13  ;;  %294 = vmatpush1.bf16.msra.mxu1 %v247_v14 }
  0x17   : > { %512 = vmatmul.mubr.msk.bf16.vlgmr.msra.gmra.mrb[0].mxu0 %vm235_vm1, %v215_v15  ;;  %514 = vmatmul.mubr.msk.bf16.vlgmr.msra.gmra.mrb[0].mxu1 %vm235_vm1, %v215_v15 }
  0x18   : > { %v345_v35 = vld [vmem:[#allocation2] sm:$0xff] (!%p515_p4)  ;;  %v354_v38 = vld [vmem:[#allocation3] sm:$0xff] (!%p515_p4) }
  0xe7   : > { %337 = sbr.rel (%p515_p4) target bundleno = 391 (0x187), region = 40 }
  0xea   : > { %v679_v16 = vpop.f32.mrb[0].mxu0  ;;  %v681_v17 = vpop.f32.mrb[0].mxu1 }
  0xeb   : > { %v683_v18 = vpop.f32.mrb[1].mxu0  ;;  %v685_v19 = vpop.f32.mrb[1].mxu1  ;;  %v355_v25 = vmul.f32 (!%p515_p4), %v679_v16, %v679_v16  ;;  %v357_v27 = vmul.f32 (!%p515_p4), %v681_v17, %v681_v17 }
  0xec   : > { %v290_v20 = vpop.f32.mrb[2].mxu0  ;;  %v331_v21 = vpop.f32.mrb[2].mxu1  ;;  %v346_v24 = vadd.f32 (!%p515_p4), %v683_v18, %v679_v16  ;;  %v356_v26 = vmul.f32 (!%p515_p4), %v683_v18, %v683_v18  ;;  %v358_v29 = vmul.f32 (!%p515_p4), %v685_v19, %v685_v19 }
  0xed   : > { %v291_v22 = vpop.f32.mrb[3].mxu0  ;;  %v332_v23 = vpop.f32.mrb[3].mxu1 }
  0xee   : > { %v347_v28 = vadd.f32 %v346_v24, %v681_v17  ;;  %v359_v30 = vadd.f32 %v356_v26, %v355_v25 }
  0xf0   : > { %v348_v31 = vadd.f32 %v347_v28, %v685_v19  ;;  %v360_v32 = vadd.f32 %v359_v30, %v357_v27 }
  0xf2   : > { %349 = vadd.xlane.f32.xlu0 %v348_v31  ;;  %v361_v33 = vadd.f32 %v360_v32, %v358_v29 }
  0xf6   : > { %362 = vadd.xlane.f32.xlu0 %v361_v33 }
 0x17f   : > { %v350_v36 = vpop.xlane.xlu0 %349 }
 0x180   : > { %v351_v37 = vadd.f32 %v350_v36, %v345_v35 }
 0x182   : > { %353 = vst.msk [vmem:[#allocation2] sm:$0xff] %vm342_vm2, %v351_v37 }
 0x183   : > { %v363_v39 = vpop.xlane.xlu0 %362 }
 0x184   : > { %v364_v40 = vadd.f32 %v363_v39, %v354_v38 }
 0x186   : > { %365 = vst.msk [vmem:[#allocation3] sm:$0xff] %vm342_vm2, %v364_v40 }
 0x187 PF: > { %p366_p5 = scmp.eq.s32.totalorder %s611_s15, 1 }
 0x188   : > { %v379_v49 = vld [vmem:[%s750_s2] sm:$0xff] (%p366_p5)  ;;  %vm383_vm3 = vcmask (%p366_p5), 7168  }
 0x189   : > { %371 = sbr.rel (!%p366_p5) target bundleno = 424 (0x1a8), region = 48  ;;  %v372_v41 = vld [vmem:[#allocation2] sm:$0xff] (%p366_p5) }
 0x18a   : > { %v373_v43 = vmul.f32 (%p366_p5), 0.001953125, %v372_v41  ;;  %v385_v52 = vld [vmem:[%s751_s3] sm:$0xff] (%p366_p5) }
 0x18c   : > { %v376_v45 = vmul.f32 (%p366_p5), %v373_v43, %v373_v43 }
 0x18d   : > { %v374_v42 = vld [vmem:[#allocation3] sm:$0xff] (%p366_p5) }
 0x18e   : > { %v375_v44 = vmul.f32 (%p366_p5), 0.001953125, %v374_v42 }
 0x190   : > { %v377_v46 = vsub.f32 %v375_v44, %v376_v45 }
 0x192   : > { %v378_v47 = vmax.f32 %v377_v46, 0.0 }
 0x194   : > { %v380_v48 = vadd.f32 1e-05, %v378_v47 }
 0x196   : > { %564 = vrsqrt.f32 %v380_v48 }
 0x1a0   : > { %v565_v50 = vpop.eup %564 }
 0x1a1   : > { %v382_v51 = vmul.f32 %v565_v50, %v379_v49 }
 0x1a3   : > { %384 = vst.msk [vmem:[#allocation4] sm:$0xff] %vm383_vm3, %v382_v51  ;;  %v386_v53 = vmul.f32 %v382_v51, %v373_v43 }
 0x1a5   : > { %v387_v54 = vsub.f32 %v385_v52, %v386_v53 }
 0x1a7   : > { %388 = vst.msk [vmem:[#allocation5] sm:$0xff] %vm383_vm3, %v387_v54 }
 0x1a8 PF: > { %p517_p6 = scmp.ne.s32.totalorder %s611_s15, 1 }
 0x1a9   : > { %v624_v56 = vmov (!%p517_p6), 0  }
 0x1aa   : > { %391 = sbr.rel (%p517_p6) target bundleno = 565 (0x235), region = 52  ;;  %v392_v55 = vld [vmem:[#allocation4] sm:$0xff] (!%p517_p6)  ;;  %566 = vset.pattern.permute.xlu0 (!%p517_p6), %v624_v56 }
 0x1ab   : > { %395 = vperm.xlu0 (!%p517_p6), %566, %v392_v55  }
 0x1ae   : > { %v402_v57 = vld [vmem:[#allocation5] sm:$0xff] (!%p517_p6) }
 0x1af   : > { %405 = vperm.xlu0 (!%p517_p6), %566, %v402_v57  }
 0x22a   : > { %v396_v58 = vpop.permute.xlu0 %395 }
 0x22b   : > { %v398_v59 = vmul.f32 %v396_v58, %v679_v16  ;;  %v399_v60 = vmul.f32 %v396_v58, %v683_v18  ;;  %v400_v61 = vmul.f32 %v396_v58, %v681_v17  ;;  %v401_v62 = vmul.f32 %v396_v58, %v685_v19 }
 0x22e   : > { %v406_v63 = vpop.permute.xlu0 %405 }
 0x22f   : > { %v408_v0 = vadd.f32 %v406_v63, %v398_v59  ;;  %v409_v1 = vadd.f32 %v406_v63, %v399_v60  ;;  %v410_v2 = vadd.f32 %v406_v63, %v400_v61  ;;  %v411_v3 = vadd.f32 %v406_v63, %v401_v62 }
 0x231   : > { %v412_v4 = vmax.f32 %v408_v0, 0.0  ;;  %v413_v5 = vmax.f32 %v409_v1, 0.0  ;;  %v414_v6 = vmax.f32 %v410_v2, 0.0  ;;  %v415_v7 = vmax.f32 %v411_v3, 0.0 }
 0x233   : > { %416 = vst [vmem:[#allocation6] sm:$0xff] %v412_v4  ;;  %417 = vst [vmem:[#allocation6 + $0x8] sm:$0xff] %v413_v5 }
 0x234   : > { %418 = vst [vmem:[#allocation6 + $0x10] sm:$0xff] %v414_v6  ;;  %419 = vst [vmem:[#allocation6 + $0x18] sm:$0xff] %v415_v7 }
 0x235 PF: > { %p714_p7 = scmp.eq.s32.totalorder %s506_s18, 1  ;;  %s625_s30 = smov [#allocation6]  }
 0x236   : > { %s436_s5 = sshll.u32 %s625_s30, 4  ;;  %s437_s5 = int_to_ptr.vmem [resolvable:$true] %s436_s5 }
 0x237   : > { %s567_s6 = scalar_lea.vmem %s437_s5, 512  ;;  %s573_s7 = scalar_lea.vmem %s437_s5, 1024 }
 0x238   : > { %p568_p8 = scmp.ne.s32.totalorder %s437_s5, %s567_s6  ;;  %p574_p11 = scmp.lt.s32.totalorder %s437_s5, %s437_s5 }
 0x239   : > { %p575_p12 = scmp.lt.s32.totalorder %s573_s7, %s567_s6 }
 0x23a   : > { %p569_p9 = pnand %p568_p8, %p714_p7 }
 0x23b   : > { %p576_p13 = por %p575_p12, %p574_p11 }
 0x23c   : > { %p570_p10 = pneg %p569_p9 }
 0x23e   : > { %p577_p0 = pnand %p576_p13, %p570_p10 }
 0x240   : > { %580 = shalt.err (!%p577_p0)
}
 0x241   : > { %s581_s10 = scalar_lea.hbm %s752_s4, 512 }
 0x242   : > { %p582_p1 = scmp.ne.s32.totalorder %s752_s4, %s581_s10  ;;  %p587_p4 = scmp.lt.u32.totalorder %s581_s10, %s752_s4 }
 0x244   : > { %p583_p2 = pnand %p582_p1, %p714_p7 }
 0x246   : > { %p584_p3 = pneg %p583_p2 }
 0x248   : > { %p589_p5 = pnand %p587_p4, %p584_p3 }
 0x24a   : > { %592 = shalt.err (!%p589_p5)
}
 0x24b   : > { %524 = dma.vmem_to_hbm [thread:$0]  (%p714_p7), %s437_s5, 512, %s752_s4, [#allocation7]  }
 0x24c PF: > { %p532_p6 = scmp.ge.s32.totalorder %s619_s17, 2  ;;  %p533_p8 = scmp.eq.s32.totalorder %s507_s19, 1 }
 0x24e   : > { %p528_p9 = pnand %p533_p8, %p532_p6 }
 0x250   : > { %606 = dma.done.wait (!%p528_p9), [#allocation7], 512  }
 0x251   : > { %608 = vsyncadd (!%p528_p9), [#allocation7], 4294966784  ;;  %s17_s17 = sadd.s32 1, %s619_s17   ;;  %s754_s15 = smov %s615_s16 }
 0x252   : > { %p14_p10 = scmp.ge.s32.totalorder %s17_s17, 4   ;;  %s755_s16 = smov %s757_s20 }
 0x254   :  { %16 = sbr.rel (!%p14_p10) target bundleno = 3 (0x3), region = 87 }
 0x25b   :  { %454 = vsyncpa [#allocation7], 1 }
 0x25c   :  { %456 = vsyncpa [#allocation7 + $0x1], 1 }

</bundles_post_ra>
